<compile_context>
chip_gen: v6e
topology: v6e:2x2x1
jax: 0.10.0
libtpu: 0.0.40
codegen_flags: <defaults>
</compile_context>

<pallas_src>
import functools

import jax
import jax.numpy as jnp
from jax.experimental import pallas as pl
from jax.experimental.pallas import tpu as pltpu


def _round_up(n, m):
    return ((n + m - 1) // m) * m


# -----------------------------------------------------------------------------
# Kernel: one grid step = one batch tile; whole MLP + softmax fused.
# -----------------------------------------------------------------------------
def actor_softmax_kernel(x_ref, w1_ref, b1_ref, w2_ref, b2_ref, w3_ref, b3_ref,
                         out_ref):
    mm_dtype = w1_ref.dtype  # MXU operand dtype (bf16 default); accum is f32.

    # x stays f32 in HBM; cast in-register right before the MXU.
    x = x_ref[...].astype(mm_dtype)

    # fc1 + relu  (MXU matmul, f32 accumulation; bias/activations stay f32)
    h1 = jnp.dot(x, w1_ref[...], preferred_element_type=jnp.float32) + b1_ref[...]
    h1 = jnp.maximum(h1, 0.0)

    # fc2 + relu
    h2 = jnp.dot(h1.astype(mm_dtype), w2_ref[...],
                 preferred_element_type=jnp.float32) + b2_ref[...]
    h2 = jnp.maximum(h2, 0.0)

    # fc3 + softmax over the lane-dense (padded-to-128) last axis.  Padded
    # logit lanes carry a -1e30 bias (f32) -> exp() == 0 -> they do not
    # contribute to the denominator.
    logits = jnp.dot(h2.astype(mm_dtype), w3_ref[...],
                     preferred_element_type=jnp.float32) + b3_ref[...]
    m = jnp.max(logits, axis=-1, keepdims=True)
    e = jnp.exp(logits - m)
    denom = jnp.sum(e, axis=-1, keepdims=True)
    # Exact reciprocal: rows sum to 1 to f32 precision (safe for sampling /
    # entropy math).  The divide is on a (TB, 1) column -> negligible cost.
    out_ref[...] = (e * (1.0 / denom)).astype(out_ref.dtype)


# -----------------------------------------------------------------------------
# Wrapper (jit'ed; weight prep hoisted out via prepare_params)
# -----------------------------------------------------------------------------
@functools.partial(jax.jit, static_argnames=("out_dim", "tile_b", "out_dtype"))
def _actor_softmax_impl(x, w1p, b1p, w2p, b2p, w3p, b3p, *,
                        out_dim, tile_b, out_dtype):
    B, input_dim = x.shape
    H = w1p.shape[1]
    N = w3p.shape[1]

    # Batch tile: sublane-aligned, big by default, capped at ceil(B/2) so the
    # "parallel" grid has >= 2 steps (both v7x TensorCores busy) when possible.
    TB = min(_round_up(tile_b, 8), max(8, _round_up(pl.cdiv(B, 2), 8)))
    B_pad = _round_up(B, TB)
    grid = (B_pad // TB,)

    xp = x if B_pad == B else jnp.pad(x, ((0, B_pad - B), (0, 0)))

    moving = lambda shape: pl.BlockSpec(shape, lambda i: (i, 0))    # follows batch
    resident = lambda shape: pl.BlockSpec(shape, lambda i: (0, 0))  # weights stay put
    # (Optional micro-opt: pipeline_mode=pl.Buffered(1) on the resident specs
    #  to drop their dead double-buffer; omitted -- ample VMEM headroom here.)

    out_pad = pl.pallas_call(
        actor_softmax_kernel,
        out_shape=jax.ShapeDtypeStruct((B_pad, N), out_dtype),
        grid=grid,
        in_specs=[
            moving((TB, input_dim)),                 # x: K left unpadded (no 8x DMA inflation)
            resident((input_dim, H)), resident((1, H)),
            resident((H, H)), resident((1, H)),
            resident((H, N)), resident((1, N)),
        ],
        out_specs=moving((TB, N)),
        compiler_params=pltpu.CompilerParams(
            dimension_semantics=("parallel",)),
    )(xp, w1p, b1p, w2p, b2p, w3p, b3p)

    return out_pad[:B, :out_dim]


def prepare_params(params, matmul_dtype=jnp.bfloat16):
    """One-time pad/cast of the ActorSoftmax weights (hoisted out of the
    per-call path).  Weights are [in_features, out_features], biases 1-D."""
    w1, b1 = params["w1"], params["b1"]
    w2, b2 = params["w2"], params["b2"]
    w3, b3 = params["w3"], params["b3"]
    hidden = w1.shape[1]
    out_dim = w3.shape[1]
    H = _round_up(hidden, 128)
    N = _round_up(out_dim, 128)
    return {
        # Input-feature (K) dim intentionally NOT padded.
        "w1": jnp.pad(w1, ((0, 0), (0, H - hidden))).astype(matmul_dtype),
        "b1": jnp.pad(b1.reshape(1, -1), ((0, 0), (0, H - hidden))).astype(jnp.float32),
        "w2": jnp.pad(w2, ((0, H - hidden), (0, H - hidden))).astype(matmul_dtype),
        "b2": jnp.pad(b2.reshape(1, -1), ((0, 0), (0, H - hidden))).astype(jnp.float32),
        "w3": jnp.pad(w3, ((0, H - hidden), (0, N - out_dim))).astype(matmul_dtype),
        # Padded output lanes get a huge negative bias -> softmax gives them 0.
        # Keep b3 (and logits) in f32 so -1e30 stays representable.
        "b3": jnp.pad(b3.reshape(1, -1), ((0, 0), (0, N - out_dim)),
                      constant_values=-1e30).astype(jnp.float32),
        "out_dim": out_dim,
    }


def actor_softmax(x, prepared, *, tile_b=1024, out_dtype=jnp.float32):
    """softmax(fc3(relu(fc2(relu(fc1(x)))))), softmax over dim=1."""
    return _actor_softmax_impl(
        x, prepared["w1"], prepared["b1"], prepared["w2"], prepared["b2"],
        prepared["w3"], prepared["b3"],
        out_dim=prepared["out_dim"], tile_b=tile_b, out_dtype=out_dtype)


# -----------------------------------------------------------------------------
# Reference / init (mimics nn.Linear default init) / self-test
# -----------------------------------------------------------------------------
def init_params(key, input_dim, output_dim, hidden_dim=256):
    ks = jax.random.split(key, 6)

    def linear(kw, kb, fan_in, fan_out):
        bound = 1.0 / jnp.sqrt(jnp.float32(fan_in))
        w = jax.random.uniform(kw, (fan_in, fan_out), jnp.float32, -bound, bound)
        b = jax.random.uniform(kb, (fan_out,), jnp.float32, -bound, bound)
        return w, b

    w1, b1 = linear(ks[0], ks[1], input_dim, hidden_dim)
    w2, b2 = linear(ks[2], ks[3], hidden_dim, hidden_dim)
    w3, b3 = linear(ks[4], ks[5], hidden_dim, output_dim)
    return {"w1": w1, "b1": b1, "w2": w2, "b2": b2, "w3": w3, "b3": b3}


def actor_softmax_ref(x, p):
    h1 = jnp.maximum(x @ p["w1"] + p["b1"], 0.0)
    h2 = jnp.maximum(h1 @ p["w2"] + p["b2"], 0.0)
    logits = h2 @ p["w3"] + p["b3"]
    return jax.nn.softmax(logits, axis=1)


if __name__ == "__main__":
    key = jax.random.PRNGKey(0)
    k_param, k_x1, k_x2 = jax.random.split(key, 3)

    input_dim, output_dim, hidden_dim = 16, 8, 256
    params = init_params(k_param, input_dim, output_dim, hidden_dim)

    # --- small batch, f32 MXU operands (tight tolerance) ----------------------
    prep_f32 = prepare_params(params, matmul_dtype=jnp.float32)
    x_small = jax.random.normal(k_x1, (4, input_dim), jnp.float32)
    out_small = jax.block_until_ready(actor_softmax(x_small, prep_f32))
    ref_small = actor_softmax_ref(x_small, params)
    assert out_small.shape == (4, output_dim)
    assert jnp.allclose(jnp.sum(out_small, axis=1), 1.0, atol=1e-3)
    assert jnp.allclose(out_small, ref_small, atol=1e-3, rtol=1e-3)

    # --- larger, non-multiple-of-tile batch; default bf16 MXU path, grid >= 2 -
    prep_bf16 = prepare_params(params)  # matmul_dtype=jnp.bfloat16 (default)
    x_big = jax.random.normal(k_x2, (300, input_dim), jnp.float32)
    out_big = jax.block_until_ready(actor_softmax(x_big, prep_bf16))
    ref_big = actor_softmax_ref(x_big, params)
    assert out_big.shape == (300, output_dim)
    assert jnp.allclose(jnp.sum(out_big, axis=1), 1.0, atol=1e-3)
    assert jnp.allclose(out_big, ref_big, atol=2e-2, rtol=2e-2)

    print("KERNEL_OK")
</pallas_src>

<mosaic_0001>
module attributes {stable_mosaic.version = 11 : i64} {
  func.func @actor_softmax_kernel(%arg0: i32, %arg1: memref<8x16xf32, #tpu.memory_space<vmem>>, %arg2: memref<16x256xf32, #tpu.memory_space<vmem>>, %arg3: memref<1x256xf32, #tpu.memory_space<vmem>>, %arg4: memref<256x256xf32, #tpu.memory_space<vmem>>, %arg5: memref<1x256xf32, #tpu.memory_space<vmem>>, %arg6: memref<256x128xf32, #tpu.memory_space<vmem>>, %arg7: memref<1x128xf32, #tpu.memory_space<vmem>>, %arg8: memref<8x128xf32, #tpu.memory_space<vmem>>) attributes {dimension_semantics = [#tpu.dimension_semantics<parallel>], iteration_bounds = array<i64: 1>, scalar_prefetch = 0 : i64, scratch_operands = 0 : i64, tpu.core_type = #tpu.core_type<tc>, window_params = [{transform_indices = @transform_0, window_bounds = array<i64: 8, 16>}, {pipeline_mode = #tpu.pipeline_mode<synchronous>, transform_indices = @transform_1, window_bounds = array<i64: 16, 256>}, {pipeline_mode = #tpu.pipeline_mode<synchronous>, transform_indices = @transform_2, window_bounds = array<i64: 1, 256>}, {pipeline_mode = #tpu.pipeline_mode<synchronous>, transform_indices = @transform_3, window_bounds = array<i64: 256, 256>}, {pipeline_mode = #tpu.pipeline_mode<synchronous>, transform_indices = @transform_4, window_bounds = array<i64: 1, 256>}, {pipeline_mode = #tpu.pipeline_mode<synchronous>, transform_indices = @transform_5, window_bounds = array<i64: 256, 128>}, {pipeline_mode = #tpu.pipeline_mode<synchronous>, transform_indices = @transform_6, window_bounds = array<i64: 1, 128>}, {transform_indices = @transform_7, window_bounds = array<i64: 8, 128>}]} {
    %c0 = arith.constant 0 : index
    %c0_0 = arith.constant 0 : index
    %0 = vector.load %arg1[%c0, %c0_0] : memref<8x16xf32, #tpu.memory_space<vmem>>, vector<8x16xf32>
    %c0_1 = arith.constant 0 : index
    %c0_2 = arith.constant 0 : index
    %1 = vector.load %arg2[%c0_1, %c0_2] : memref<16x256xf32, #tpu.memory_space<vmem>>, vector<16x256xf32>
    %cst = arith.constant dense<0.000000e+00> : vector<8x256xf32>
    %2 = tpu.matmul %0, %1, %cst {dimension_numbers = #tpu.dot_dimension_numbers<[1], [0], [0], [1], [0, 0, 1, 1], [], []>} : vector<8x16xf32>, vector<16x256xf32>, vector<8x256xf32> -> vector<8x256xf32>
    %c0_3 = arith.constant 0 : index
    %c0_4 = arith.constant 0 : index
    %3 = vector.load %arg3[%c0_3, %c0_4] : memref<1x256xf32, #tpu.memory_space<vmem>>, vector<1x256xf32>
    %4 = vector.broadcast %3 : vector<1x256xf32> to vector<8x256xf32>
    %5 = arith.addf %2, %4 : vector<8x256xf32>
    %cst_5 = arith.constant 0.000000e+00 : f32
    %6 = vector.broadcast %cst_5 : f32 to vector<8x256xf32>
    %7 = arith.maximumf %5, %6 : vector<8x256xf32>
    %c0_6 = arith.constant 0 : index
    %c0_7 = arith.constant 0 : index
    %8 = vector.load %arg4[%c0_6, %c0_7] : memref<256x256xf32, #tpu.memory_space<vmem>>, vector<256x256xf32>
    %cst_8 = arith.constant dense<0.000000e+00> : vector<8x256xf32>
    %9 = tpu.matmul %7, %8, %cst_8 {dimension_numbers = #tpu.dot_dimension_numbers<[1], [0], [0], [1], [0, 0, 1, 1], [], []>} : vector<8x256xf32>, vector<256x256xf32>, vector<8x256xf32> -> vector<8x256xf32>
    %c0_9 = arith.constant 0 : index
    %c0_10 = arith.constant 0 : index
    %10 = vector.load %arg5[%c0_9, %c0_10] : memref<1x256xf32, #tpu.memory_space<vmem>>, vector<1x256xf32>
    %11 = vector.broadcast %10 : vector<1x256xf32> to vector<8x256xf32>
    %12 = arith.addf %9, %11 : vector<8x256xf32>
    %cst_11 = arith.constant 0.000000e+00 : f32
    %13 = vector.broadcast %cst_11 : f32 to vector<8x256xf32>
    %14 = arith.maximumf %12, %13 : vector<8x256xf32>
    %c0_12 = arith.constant 0 : index
    %c0_13 = arith.constant 0 : index
    %15 = vector.load %arg6[%c0_12, %c0_13] : memref<256x128xf32, #tpu.memory_space<vmem>>, vector<256x128xf32>
    %cst_14 = arith.constant dense<0.000000e+00> : vector<8x128xf32>
    %16 = tpu.matmul %14, %15, %cst_14 {dimension_numbers = #tpu.dot_dimension_numbers<[1], [0], [0], [1], [0, 0, 1, 1], [], []>} : vector<8x256xf32>, vector<256x128xf32>, vector<8x128xf32> -> vector<8x128xf32>
    %c0_15 = arith.constant 0 : index
    %c0_16 = arith.constant 0 : index
    %17 = vector.load %arg7[%c0_15, %c0_16] : memref<1x128xf32, #tpu.memory_space<vmem>>, vector<1x128xf32>
    %18 = vector.broadcast %17 : vector<1x128xf32> to vector<8x128xf32>
    %19 = arith.addf %16, %18 : vector<8x128xf32>
    %cst_17 = arith.constant dense<0xFF800000> : vector<8xf32>
    %20 = vector.multi_reduction <maximumf>, %19, %cst_17 [1] : vector<8x128xf32> to vector<8xf32>
    %21 = vector.shape_cast %20 : vector<8xf32> to vector<8x1xf32>
    %22 = vector.broadcast %21 : vector<8x1xf32> to vector<8x128xf32>
    %23 = arith.subf %19, %22 : vector<8x128xf32>
    %24 = math.exp %23 : vector<8x128xf32>
    %cst_18 = arith.constant dense<0.000000e+00> : vector<8xf32>
    %25 = vector.multi_reduction <add>, %24, %cst_18 [1] : vector<8x128xf32> to vector<8xf32>
    %26 = vector.shape_cast %25 : vector<8xf32> to vector<8x1xf32>
    %cst_19 = arith.constant 1.000000e+00 : f32
    %27 = vector.broadcast %cst_19 : f32 to vector<8x1xf32>
    %28 = arith.divf %27, %26 : vector<8x1xf32>
    %29 = vector.broadcast %28 : vector<8x1xf32> to vector<8x128xf32>
    %30 = arith.mulf %24, %29 : vector<8x128xf32>
    %c0_20 = arith.constant 0 : index
    %c0_21 = arith.constant 0 : index
    %31 = vector.load %arg8[%c0_20, %c0_21] : memref<8x128xf32, #tpu.memory_space<vmem>>, vector<8x128xf32>
    tpu.vector_store %arg8[%c0_20, %c0_21], %30 {strides = array<i32>} : memref<8x128xf32, #tpu.memory_space<vmem>>, vector<8x128xf32>,
    return
  }
  func.func @transform_0(%arg0: i32) -> (i32, i32) {
    %c0_i32 = arith.constant 0 : i32
    %c0_i32_0 = arith.constant 0 : i32
    return %arg0, %c0_i32 : i32, i32
  }
  func.func @transform_1(%arg0: i32) -> (i32, i32) {
    %c0_i32 = arith.constant 0 : i32
    %c0_i32_0 = arith.constant 0 : i32
    %c0_i32_1 = arith.constant 0 : i32
    return %c0_i32, %c0_i32_0 : i32, i32
  }
  func.func @transform_2(%arg0: i32) -> (i32, i32) {
    %c0_i32 = arith.constant 0 : i32
    %c0_i32_0 = arith.constant 0 : i32
    %c0_i32_1 = arith.constant 0 : i32
    return %c0_i32, %c0_i32_0 : i32, i32
  }
  func.func @transform_3(%arg0: i32) -> (i32, i32) {
    %c0_i32 = arith.constant 0 : i32
    %c0_i32_0 = arith.constant 0 : i32
    %c0_i32_1 = arith.constant 0 : i32
    return %c0_i32, %c0_i32_0 : i32, i32
  }
  func.func @transform_4(%arg0: i32) -> (i32, i32) {
    %c0_i32 = arith.constant 0 : i32
    %c0_i32_0 = arith.constant 0 : i32
    %c0_i32_1 = arith.constant 0 : i32
    return %c0_i32, %c0_i32_0 : i32, i32
  }
  func.func @transform_5(%arg0: i32) -> (i32, i32) {
    %c0_i32 = arith.constant 0 : i32
    %c0_i32_0 = arith.constant 0 : i32
    %c0_i32_1 = arith.constant 0 : i32
    return %c0_i32, %c0_i32_0 : i32, i32
  }
  func.func @transform_6(%arg0: i32) -> (i32, i32) {
    %c0_i32 = arith.constant 0 : i32
    %c0_i32_0 = arith.constant 0 : i32
    %c0_i32_1 = arith.constant 0 : i32
    return %c0_i32, %c0_i32_0 : i32, i32
  }
  func.func @transform_7(%arg0: i32) -> (i32, i32) {
    %c0_i32 = arith.constant 0 : i32
    %c0_i32_0 = arith.constant 0 : i32
    return %arg0, %c0_i32 : i32, i32
  }
}

</mosaic_0001>

<bundles_post_ra>
// kernel: _actor_softmax_impl.1
= control target key start
LH: loop header
LB: loop body
LE: loop exit
PB: predicated region body
PF: predicated region fallthrough
CT: control target
= control target key end

     0   :  { %12 = vsyncpa [#allocation3], 0  ;;  %s621_s0 = inlined_call_operand.vmem [shape: f32[8,16], index: 0, kind: input, shape index: {}]   ;;  %s622_s1 = inlined_call_operand.hbm [shape: f32[16,256], index: 1, kind: input, shape index: {}]   ;;  %s623_s2 = inlined_call_operand.vmem [shape: f32[1,256], index: 2, kind: input, shape index: {}]   ;;  %s624_s3 = inlined_call_operand.hbm [shape: f32[256,256], index: 3, kind: input, shape index: {}]   ;;  %s625_s4 = inlined_call_operand.vmem [shape: f32[1,256], index: 4, kind: input, shape index: {}]   ;;  %s626_s5 = inlined_call_operand.hbm [shape: f32[256,128], index: 5, kind: input, shape index: {}]   ;;  %s627_s6 = inlined_call_operand.vmem [shape: f32[1,128], index: 6, kind: input, shape index: {}]   ;;  %s628_s7 = inlined_call_operand.vmem [shape: f32[8,128], index: 7, kind: output, shape index: {}]  }
   0x1   :  { %13 = vsyncpa [#allocation5], 0  ;;  %s549_s24 = smov [#allocation4]   ;;  %s550_s26 = smov [#allocation2]  }
   0x2   :  { %s35_s25 = sshll.u32 %s549_s24, 4  ;;  %s21_s27 = sshll.u32 %s550_s26, 4  ;;  %s36_s25 = int_to_ptr.vmem [resolvable:$true] %s35_s25  ;;  %s22_s27 = int_to_ptr.vmem [resolvable:$true] %s21_s27 }
   0x3   :  { %s493_s28 = scalar_lea.vmem %s36_s25, 8192  ;;  %p498_p1 = scmp.lt.s32.totalorder %s36_s25, %s36_s25 }
   0x4   :  { %p494_p0 = scmp.ne.s32.totalorder %s36_s25, %s493_s28  ;;  %p499_p2 = scmp.lt.s32.totalorder %s493_s28, %s493_s28 }
   0x6   :  { %p500_p3 = por %p499_p2, %p498_p1 }
   0x8   :  { %p501_p4 = pnand %p500_p3, %p494_p0 }
   0xa   :  { %504 = shalt.err (!%p501_p4)
}
   0xb   :  { %s551_s29 = smov 256   ;;  %s552_s30 = smov 16  }
   0xc   :  { %41 = dma.hbm_to_vmem [thread:$0]  %s624_s3, 8192, %s36_s25, [#allocation5], %s551_s29, %s551_s29, %s552_s30  }
   0xd   :  { %s513_s10 = scalar_lea.vmem %s22_s27, 512  ;;  %p518_p6 = scmp.lt.s32.totalorder %s22_s27, %s22_s27 }
   0xe   :  { %p514_p5 = scmp.ne.s32.totalorder %s22_s27, %s513_s10  ;;  %p519_p7 = scmp.lt.s32.totalorder %s513_s10, %s513_s10 }
  0x10   :  { %p520_p8 = por %p519_p7, %p518_p6 }
  0x12   :  { %p521_p9 = pnand %p520_p8, %p514_p5 }
  0x14   :  { %524 = shalt.err (!%p521_p9)
}
  0x15   :  { %27 = dma.hbm_to_vmem [thread:$0]  %s622_s1, 512, %s22_s27, [#allocation3], %s551_s29, %s551_s29, %s552_s30  }
  0x16   :  { %s553_s13 = smov [#allocation6]  }
  0x17   :  { %s49_s14 = sshll.u32 %s553_s13, 4  ;;  %s50_s14 = int_to_ptr.vmem [resolvable:$true] %s49_s14 }
  0x18   :  { %s533_s15 = scalar_lea.vmem %s50_s14, 4096  ;;  %p538_p11 = scmp.lt.s32.totalorder %s50_s14, %s50_s14 }
  0x19   :  { %p534_p10 = scmp.ne.s32.totalorder %s50_s14, %s533_s15  ;;  %p539_p12 = scmp.lt.s32.totalorder %s533_s15, %s533_s15 }
  0x1b   :  { %p540_p13 = por %p539_p12, %p538_p11 }
  0x1d   :  { %p541_p0 = pnand %p540_p13, %p534_p10 }
  0x1f   :  { %544 = shalt.err (!%p541_p0)
}
  0x20   :  { %s554_s3 = smov 128   ;;  %s555_s16 = smov 8  }
  0x21   :  { %55 = dma.hbm_to_vmem [thread:$0]  %s626_s5, 4096, %s50_s14, [#allocation5], %s554_s3, %s554_s3, %s555_s16  }
  0x22   :  { %545 = dma.done.wait [#allocation3], 512  }
  0x23   :  { %546 = vsyncadd [#allocation3], 4294966784 }
  0x24   :  { %547 = dma.done.wait [#allocation5], 12288  }
  0x25   :  { %548 = vsyncadd [#allocation5], 4294955008  ;;  %v556_v0 = vmov 0.0   ;;  %v71_v1 = vld [vmem:[#allocation2 + $0x18] sm:$0xff]  ;;  %v70_v2 = vld [vmem:[#allocation2 + $0x10] sm:$0xff]  ;;  %vm84_vm0 = vcmask 130048  }
  0x26   :  { %152 = vmatprep.mubr.f32.mxu0 %v556_v0  ;;  %v69_v3 = vld [vmem:[#allocation2 + $0x8] sm:$0xff]  ;;  %116 = vmatprep.subr.mxu0 %v71_v1  ;;  %v68_v4 = vld [vmem:[#allocation2] sm:$0xff]  ;;  %v192_v6 = vld [vmem:[#allocation4 + $0xf8] sm:$0xff] }
  0x27   :  { %v67_v5 = vld [vmem:[%s621_s0] sm:$0xff]  ;;  %117 = vmatpush1.msra.mxu0 %v70_v2  ;;  %237 = vmatprep.subr.mxu1 %v192_v6  ;;  %v191_v7 = vld [vmem:[#allocation4 + $0xf0] sm:$0xff]  ;;  %v190_v8 = vld [vmem:[#allocation4 + $0xe8] sm:$0xff] }
  0x28   :  { %v189_v9 = vld [vmem:[#allocation4 + $0xe0] sm:$0xff]  ;;  %118 = vmatprep.subr.mxu0 %v69_v3  ;;  %238 = vmatpush1.msra.mxu1 %v191_v7  ;;  %v188_v10 = vld [vmem:[#allocation4 + $0xd8] sm:$0xff]  ;;  %v187_v11 = vld [vmem:[#allocation4 + $0xd0] sm:$0xff] }
  0x29   :  { %119 = vmatpush1.msra.mxu0 %v68_v4  ;;  %239 = vmatprep.subr.mxu1 %v190_v8  ;;  %v186_v12 = vld [vmem:[#allocation4 + $0xc8] sm:$0xff]  ;;  %v185_v13 = vld [vmem:[#allocation4 + $0xc0] sm:$0xff]  ;;  %v184_v14 = vld [vmem:[#allocation4 + $0xb8] sm:$0xff] }
  0x2a   :  { %436 = vmatmul.mubr.msk.f32.vlgmr.msra.gmra.mxu0 %vm84_vm0, %v67_v5  ;;  %240 = vmatpush1.msra.mxu1 %v189_v9  ;;  %v183_v15 = vld [vmem:[#allocation4 + $0xb0] sm:$0xff]  ;;  %v182_v16 = vld [vmem:[#allocation4 + $0xa8] sm:$0xff]  ;;  %v181_v17 = vld [vmem:[#allocation4 + $0xa0] sm:$0xff] }
  0x2b   :  { %241 = vmatprep.subr.mxu1 %v188_v10  ;;  %v180_v18 = vld [vmem:[#allocation4 + $0x98] sm:$0xff]  ;;  %v179_v19 = vld [vmem:[#allocation4 + $0x90] sm:$0xff]  ;;  %v178_v20 = vld [vmem:[#allocation4 + $0x88] sm:$0xff] }
  0x2c   :  { %242 = vmatpush1.msra.mxu1 %v187_v11  ;;  %v177_v21 = vld [vmem:[#allocation4 + $0x80] sm:$0xff]  ;;  %v176_v22 = vld [vmem:[#allocation4 + $0x78] sm:$0xff]  ;;  %v175_v23 = vld [vmem:[#allocation4 + $0x70] sm:$0xff] }
  0x2d   :  { %243 = vmatprep.subr.mxu1 %v186_v12  ;;  %v174_v24 = vld [vmem:[#allocation4 + $0x68] sm:$0xff]  ;;  %v173_v25 = vld [vmem:[#allocation4 + $0x60] sm:$0xff]  ;;  %v172_v26 = vld [vmem:[#allocation4 + $0x58] sm:$0xff] }
  0x2e   :  { %244 = vmatpush1.msra.mxu1 %v185_v13  ;;  %v171_v27 = vld [vmem:[#allocation4 + $0x50] sm:$0xff]  ;;  %v170_v28 = vld [vmem:[#allocation4 + $0x48] sm:$0xff]  ;;  %v169_v29 = vld [vmem:[#allocation4 + $0x40] sm:$0xff] }
  0x2f   :  { %245 = vmatprep.subr.mxu1 %v184_v14  ;;  %v168_v30 = vld [vmem:[#allocation4 + $0x38] sm:$0xff]  ;;  %v167_v31 = vld [vmem:[#allocation4 + $0x30] sm:$0xff]  ;;  %v166_v32 = vld [vmem:[#allocation4 + $0x28] sm:$0xff] }
  0x30   :  { %246 = vmatpush1.msra.mxu1 %v183_v15  ;;  %v165_v33 = vld [vmem:[#allocation4 + $0x20] sm:$0xff]  ;;  %v164_v34 = vld [vmem:[#allocation4 + $0x18] sm:$0xff]  ;;  %v163_v35 = vld [vmem:[#allocation4 + $0x10] sm:$0xff] }
  0x31   :  { %247 = vmatprep.subr.mxu1 %v182_v16  ;;  %v162_v36 = vld [vmem:[#allocation4 + $0x8] sm:$0xff]  ;;  %v161_v37 = vld [vmem:[#allocation4] sm:$0xff]  ;;  %v224_v38 = vld [vmem:[#allocation4 + $0x1f8] sm:$0xff] }
  0x32   :  { %248 = vmatpush1.msra.mxu1 %v181_v17  ;;  %v223_v39 = vld [vmem:[#allocation4 + $0x1f0] sm:$0xff]  ;;  %v222_v40 = vld [vmem:[#allocation4 + $0x1e8] sm:$0xff]  ;;  %v221_v41 = vld [vmem:[#allocation4 + $0x1e0] sm:$0xff] }
  0x33   :  { %249 = vmatprep.subr.mxu1 %v180_v18  ;;  %v220_v42 = vld [vmem:[#allocation4 + $0x1d8] sm:$0xff]  ;;  %v219_v43 = vld [vmem:[#allocation4 + $0x1d0] sm:$0xff]  ;;  %v218_v44 = vld [vmem:[#allocation4 + $0x1c8] sm:$0xff] }
  0x34   :  { %250 = vmatpush1.msra.mxu1 %v179_v19  ;;  %v217_v45 = vld [vmem:[#allocation4 + $0x1c0] sm:$0xff]  ;;  %v216_v46 = vld [vmem:[#allocation4 + $0x1b8] sm:$0xff]  ;;  %v215_v47 = vld [vmem:[#allocation4 + $0x1b0] sm:$0xff] }
  0x35   :  { %251 = vmatprep.subr.mxu1 %v178_v20  ;;  %v214_v48 = vld [vmem:[#allocation4 + $0x1a8] sm:$0xff]  ;;  %v213_v49 = vld [vmem:[#allocation4 + $0x1a0] sm:$0xff]  ;;  %v212_v50 = vld [vmem:[#allocation4 + $0x198] sm:$0xff] }
  0x36   :  { %252 = vmatpush1.msra.mxu1 %v177_v21  ;;  %v211_v51 = vld [vmem:[#allocation4 + $0x190] sm:$0xff]  ;;  %v210_v52 = vld [vmem:[#allocation4 + $0x188] sm:$0xff]  ;;  %v209_v53 = vld [vmem:[#allocation4 + $0x180] sm:$0xff] }
  0x37   :  { %253 = vmatprep.subr.mxu1 %v176_v22  ;;  %v208_v54 = vld [vmem:[#allocation4 + $0x178] sm:$0xff]  ;;  %v207_v55 = vld [vmem:[#allocation4 + $0x170] sm:$0xff]  ;;  %v206_v56 = vld [vmem:[#allocation4 + $0x168] sm:$0xff] }
  0x38   :  { %254 = vmatpush1.msra.mxu1 %v175_v23  ;;  %v205_v57 = vld [vmem:[#allocation4 + $0x160] sm:$0xff]  ;;  %v204_v58 = vld [vmem:[#allocation4 + $0x158] sm:$0xff]  ;;  %v203_v59 = vld [vmem:[#allocation4 + $0x150] sm:$0xff] }
  0x39   :  { %255 = vmatprep.subr.mxu1 %v174_v24  ;;  %v202_v60 = vld [vmem:[#allocation4 + $0x148] sm:$0xff]  ;;  %v201_v61 = vld [vmem:[#allocation4 + $0x140] sm:$0xff]  ;;  %v200_v62 = vld [vmem:[#allocation4 + $0x138] sm:$0xff] }
  0x3a   :  { %256 = vmatpush1.msra.mxu1 %v173_v25  ;;  %v199_v63 = vld [vmem:[#allocation4 + $0x130] sm:$0xff]  ;;  %v198_v0 = vld [vmem:[#allocation4 + $0x128] sm:$0xff]  ;;  %v197_v1 = vld [vmem:[#allocation4 + $0x120] sm:$0xff] }
  0x3b   :  { %257 = vmatprep.subr.mxu1 %v172_v26  ;;  %v196_v2 = vld [vmem:[#allocation4 + $0x118] sm:$0xff]  ;;  %v195_v3 = vld [vmem:[#allocation4 + $0x110] sm:$0xff]  ;;  %v194_v4 = vld [vmem:[#allocation4 + $0x108] sm:$0xff] }
  0x3c   :  { %258 = vmatpush1.msra.mxu1 %v171_v27  ;;  %v193_v5 = vld [vmem:[#allocation4 + $0x100] sm:$0xff]  ;;  %v341_v6 = vld [vmem:[#allocation6 + $0xf8] sm:$0xff]  ;;  %v340_v8 = vld [vmem:[#allocation6 + $0xf0] sm:$0xff] }
  0x3d   :  { %259 = vmatprep.subr.mxu1 %v170_v28  ;;  %v325_v7 = vld [vmem:[#allocation6 + $0x78] sm:$0xff]  ;;  %438 = vmatprep.subr.mxu0 %v341_v6  ;;  %v324_v9 = vld [vmem:[#allocation6 + $0x70] sm:$0xff]  ;;  %v339_v10 = vld [vmem:[#allocation6 + $0xe8] sm:$0xff] }
  0x3e   :  { %260 = vmatpush1.msra.mxu1 %v169_v29  ;;  %439 = vmatpush3.msra.mxu0 %v325_v7  ;;  %v323_v11 = vld [vmem:[#allocation6 + $0x68] sm:$0xff]  ;;  %v338_v12 = vld [vmem:[#allocation6 + $0xe0] sm:$0xff]  ;;  %v337_v14 = vld [vmem:[#allocation6 + $0xd8] sm:$0xff] }
  0x3f   :  { %261 = vmatprep.subr.mxu1 %v168_v30  ;;  %440 = vmatprep.subr.mxu0 %v340_v8  ;;  %v322_v13 = vld [vmem:[#allocation6 + $0x60] sm:$0xff]  ;;  %v321_v15 = vld [vmem:[#allocation6 + $0x58] sm:$0xff]  ;;  %v336_v16 = vld [vmem:[#allocation6 + $0xd0] sm:$0xff]  ;;  %v74_v30 = vlaneseq }
  0x40   :  { %262 = vmatpush1.msra.mxu1 %v167_v31  ;;  %441 = vmatpush3.msra.mxu0 %v324_v9  ;;  %v320_v17 = vld [vmem:[#allocation6 + $0x50] sm:$0xff]  ;;  %v335_v18 = vld [vmem:[#allocation6 + $0xc8] sm:$0xff]  ;;  %v334_v20 = vld [vmem:[#allocation6 + $0xc0] sm:$0xff] }
  0x41   :  { %263 = vmatprep.subr.mxu1 %v166_v32  ;;  %442 = vmatprep.subr.mxu0 %v339_v10  ;;  %v319_v19 = vld [vmem:[#allocation6 + $0x48] sm:$0xff]  ;;  %v318_v21 = vld [vmem:[#allocation6 + $0x40] sm:$0xff]  ;;  %v333_v22 = vld [vmem:[#allocation6 + $0xb8] sm:$0xff]  ;;  %v75_v31 = vshrl.u32 %v74_v30, 7 }
  0x42   :  { %264 = vmatpush1.msra.mxu1 %v165_v33  ;;  %443 = vmatpush3.msra.mxu0 %v323_v11  ;;  %v317_v23 = vld [vmem:[#allocation6 + $0x38] sm:$0xff]  ;;  %v332_v24 = vld [vmem:[#allocation6 + $0xb0] sm:$0xff]  ;;  %v331_v26 = vld [vmem:[#allocation6 + $0xa8] sm:$0xff] }
  0x43   :  { %265 = vmatprep.subr.mxu1 %v164_v34  ;;  %444 = vmatprep.subr.mxu0 %v338_v12  ;;  %v316_v25 = vld [vmem:[#allocation6 + $0x30] sm:$0xff]  ;;  %v315_v27 = vld [vmem:[#allocation6 + $0x28] sm:$0xff]  ;;  %v330_v28 = vld [vmem:[#allocation6 + $0xa0] sm:$0xff]  ;;  %v76_v32 = vsub.s32 0, %v75_v31  ;;  %v80_v34 = vsub.s32 1, %v75_v31 }
  0x44   :  { %266 = vmatpush1.msra.mxu1 %v163_v35  ;;  %445 = vmatpush3.msra.mxu0 %v322_v13  ;;  %v314_v29 = vld [vmem:[#allocation6 + $0x20] sm:$0xff] }
  0x45   :  { %267 = vmatprep.subr.mxu1 %v162_v36  ;;  %446 = vmatprep.subr.mxu0 %v337_v14  ;;  %v72_v33 = vld [vmem:[%s623_s2] sm:$0x3] }
  0x46   :  { %268 = vmatpush1.msra.mxu1 %v161_v37  ;;  %447 = vmatpush3.msra.mxu0 %v321_v15  ;;  %v77_v35 = vrot.slane %v72_v33, %v76_v32  ;;  %v81_v36 = vrot.slane %v72_v33, %v80_v34 }
  0x47   :  { %269 = vmatprep.subr.mxu1 %v224_v38  ;;  %448 = vmatprep.subr.mxu0 %v336_v16 }
  0x48   :  { %270 = vmatpush2.msra.mxu1 %v223_v39  ;;  %449 = vmatpush3.msra.mxu0 %v320_v17 }
  0x49   :  { %271 = vmatprep.subr.mxu1 %v222_v40  ;;  %450 = vmatprep.subr.mxu0 %v335_v18 }
  0x4a   :  { %272 = vmatpush2.msra.mxu1 %v221_v41  ;;  %451 = vmatpush3.msra.mxu0 %v319_v19 }
  0x4b   :  { %273 = vmatprep.subr.mxu1 %v220_v42  ;;  %452 = vmatprep.subr.mxu0 %v334_v20 }
  0x4c   :  { %274 = vmatpush2.msra.mxu1 %v219_v43  ;;  %453 = vmatpush3.msra.mxu0 %v318_v21  ;;  %v329_v43 = vld [vmem:[#allocation6 + $0x98] sm:$0xff] }
  0x4d   :  { %275 = vmatprep.subr.mxu1 %v218_v44  ;;  %454 = vmatprep.subr.mxu0 %v333_v22  ;;  %v313_v44 = vld [vmem:[#allocation6 + $0x18] sm:$0xff] }
  0x4e   :  { %276 = vmatpush2.msra.mxu1 %v217_v45  ;;  %455 = vmatpush3.msra.mxu0 %v317_v23  ;;  %v328_v45 = vld [vmem:[#allocation6 + $0x90] sm:$0xff] }
  0x4f   :  { %277 = vmatprep.subr.mxu1 %v216_v46  ;;  %456 = vmatprep.subr.mxu0 %v332_v24  ;;  %v312_v46 = vld [vmem:[#allocation6 + $0x10] sm:$0xff] }
  0x50   :  { %278 = vmatpush2.msra.mxu1 %v215_v47  ;;  %457 = vmatpush3.msra.mxu0 %v316_v25  ;;  %v327_v47 = vld [vmem:[#allocation6 + $0x88] sm:$0xff] }
  0x51   :  { %279 = vmatprep.subr.mxu1 %v214_v48  ;;  %458 = vmatprep.subr.mxu0 %v331_v26  ;;  %v311_v48 = vld [vmem:[#allocation6 + $0x8] sm:$0xff] }
  0x52   :  { %280 = vmatpush2.msra.mxu1 %v213_v49  ;;  %459 = vmatpush3.msra.mxu0 %v315_v27  ;;  %v326_v49 = vld [vmem:[#allocation6 + $0x80] sm:$0xff] }
  0x53   :  { %281 = vmatprep.subr.mxu1 %v212_v50  ;;  %460 = vmatprep.subr.mxu0 %v330_v28  ;;  %v310_v50 = vld [vmem:[#allocation6] sm:$0xff] }
  0x54   :  { %282 = vmatpush2.msra.mxu1 %v211_v51  ;;  %461 = vmatpush3.msra.mxu0 %v314_v29  ;;  %v225_v51 = vld [vmem:[%s625_s4] sm:$0x3] }
  0x55   :  { %283 = vmatprep.subr.mxu1 %v210_v52  ;;  %462 = vmatprep.subr.mxu0 %v329_v43  ;;  %v230_v52 = vrot.slane %v225_v51, %v76_v32 }
  0x56   :  { %284 = vmatpush2.msra.mxu1 %v209_v53  ;;  %463 = vmatpush3.msra.mxu0 %v313_v44  ;;  %v234_v53 = vrot.slane %v225_v51, %v80_v34 }
  0x57   :  { %285 = vmatprep.subr.mxu1 %v208_v54  ;;  %464 = vmatprep.subr.mxu0 %v328_v45 }
  0x58   :  { %286 = vmatpush2.msra.mxu1 %v207_v55  ;;  %465 = vmatpush3.msra.mxu0 %v312_v46 }
  0x59   :  { %287 = vmatprep.subr.mxu1 %v206_v56  ;;  %466 = vmatprep.subr.mxu0 %v327_v47 }
  0x5a   :  { %288 = vmatpush2.msra.mxu1 %v205_v57  ;;  %467 = vmatpush3.msra.mxu0 %v311_v48 }
  0x5b   :  { %289 = vmatprep.subr.mxu1 %v204_v58  ;;  %468 = vmatprep.subr.mxu0 %v326_v49 }
  0x5c   :  { %290 = vmatpush2.msra.mxu1 %v203_v59  ;;  %469 = vmatpush3.msra.mxu0 %v310_v50 }
  0x5d   :  { %291 = vmatprep.subr.mxu1 %v202_v60 }
  0x5e   :  { %292 = vmatpush2.msra.mxu1 %v201_v61 }
  0x5f   :  { %293 = vmatprep.subr.mxu1 %v200_v62  ;;  %v437_v62 = vld [vmem:[%s627_s6] ss:$0 sm:$0xff] }
  0x60   :  { %294 = vmatpush2.msra.mxu1 %v199_v63 }
  0x61   :  { %295 = vmatprep.subr.mxu1 %v198_v0 }
  0x62   :  { %296 = vmatpush2.msra.mxu1 %v197_v1 }
  0x63   :  { %297 = vmatprep.subr.mxu1 %v196_v2 }
  0x64   :  { %298 = vmatpush2.msra.mxu1 %v195_v3 }
  0x65   :  { %299 = vmatprep.subr.mxu1 %v194_v4 }
  0x66   :  { %300 = vmatpush2.msra.mxu1 %v193_v5 }
  0xea   :  { %v154_v37 = vpop.f32.mrf.mxu0 }
  0xeb   :  { %v155_v38 = vadd.f32 %v154_v37, %v77_v35 }
  0xec   :  { %v156_v39 = vpop.f32.mrf.mxu0 }
  0xed   :  { %v157_v40 = vadd.f32 %v156_v39, %v81_v36  ;;  %v159_v42 = vmax.f32 %v155_v38, 0.0 }
  0xef   :  { %v160_v41 = vmax.f32 %v157_v40, 0.0 }
  0xf1   :  { %301 = vmatprep.mubr.f32.mxu1 %v160_v41 }
  0xf2   :  { %302 = vmatmul.mubr.f32.vlgmr.msra.gmra.mxu1 %v159_v42 }
 0x1b2   :  { %v303_v54 = vpop.f32.mrf.mxu1 }
 0x1b3   :  { %v304_v55 = vadd.f32 %v303_v54, %v230_v52 }
 0x1b4   :  { %v305_v56 = vpop.f32.mrf.mxu1 }
 0x1b5   :  { %v306_v57 = vadd.f32 %v305_v56, %v234_v53  ;;  %v308_v59 = vmax.f32 %v304_v55, 0.0 }
 0x1b7   :  { %v309_v58 = vmax.f32 %v306_v57, 0.0 }
 0x1b9   :  { %413 = vmatprep.mubr.f32.mxu0 %v309_v58 }
 0x1ba   :  { %414 = vmatmul.mubr.f32.vlgmr.msra.gmra.mxu0 %v308_v59 }
 0x27a   :  { %v470_v60 = vpop.f32.mrf.mxu0 }
 0x27c   :  { %v471_v61 = vpop.f32.mrf.mxu0 }
 0x27d   :  { %v472_v63 = vadd.f32 %v471_v61, %v470_v60 }
 0x27f   :  { %v416_v0 = vadd.f32 %v472_v63, %v437_v62 }
 0x281   :  { %419 = vmax.xlane.f32.xlu0 %v416_v0 }
 0x30a   :  { %v420_v1 = vpop.xlane.xlu0 %419 }
 0x30b   :  { %v421_v2 = vsub.f32 %v416_v0, %v420_v1 }
 0x30d   :  { %v422_v3 = vmul.f32 1.442695, %v421_v2 }
 0x30f   :  { %481 = vpow2.f32 %v422_v3 }
 0x31c   :  { %v482_v4 = vpop.eup %481 }
 0x31d   :  { %424 = vadd.xlane.f32.xlu0 %v482_v4 }
 0x3a6   :  { %v425_v5 = vpop.xlane.xlu0 %424 }
 0x3a7   :  { %483 = vrcp.f32 %v425_v5 }
 0x3b4   :  { %v484_v6 = vpop.eup %483 }
 0x3b5   :  { %v428_v7 = vmul.f32 %v484_v6, %v482_v4 }
 0x3b7   :  { %429 = vst [vmem:[%s628_s7] sm:$0xff] %v428_v7 }
 0x3b8   :  { %434 = vsyncpa [#allocation3], 1 }
 0x3b9   :  { %435 = vsyncpa [#allocation5], 1 }

</bundles_post_ra>
